<compile_context>
chip_gen: v7x
topology: tpu7x:2x2x1
jax: 0.10.0
libtpu: 0.0.40
codegen_flags: <defaults>
</compile_context>

<pallas_src>
import functools

import jax
import jax.numpy as jnp
from jax import lax
from jax.experimental import pallas as pl
from jax.experimental.pallas import tpu as pltpu

# bf16 MXU operands -> full-rate MXU on v5e/v6e/v7x; accumulation stays f32.
MXU_DTYPE = jnp.bfloat16


def _mxu(x):
    return x.astype(MXU_DTYPE)


@functools.lru_cache(maxsize=None)
def _vmem_limit_bytes():
    cap = 64 * 1024 * 1024
    try:
        cap = int(getattr(pltpu.get_tpu_info(), "vmem_capacity_bytes", cap))
    except Exception:
        pass
    # ~75% of physical VMEM, capped; leaves headroom for double-buffering and
    # internal scratch on v7x (64 MiB) while using the larger v5e/v6e VMEM.
    return min(int(cap * 0.75), 100 * 1024 * 1024)


# --------------------------------------------------------------------------
# Kernel 1: matmul + bias (the qkv 1x1 convolution), fixed row tiling
# --------------------------------------------------------------------------
def _matmul_bias_kernel(x_ref, w_ref, b_ref, o_ref):
    acc = jnp.dot(_mxu(x_ref[...]), _mxu(w_ref[...]),
                  preferred_element_type=jnp.float32)
    o_ref[...] = (acc + b_ref[...].astype(jnp.float32)).astype(o_ref.dtype)


def conv1x1(x2d, w, bias, *, row_tile=1024):
    """x2d: (N, Cin), w: (Cin, Cout), bias: (Cout,) -> (N, Cout)."""
    n, cin = x2d.shape
    cout = w.shape[1]
    rt = n if n <= row_tile else row_tile      # large fixed tile, no host-side pad
    grid = pl.cdiv(n, rt)                      # trailing partial block masked by Pallas
    cost = pl.CostEstimate(
        flops=2 * n * cin * cout, transcendentals=0,
        bytes_accessed=4 * (n * cin + cin * cout + cout + n * cout))
    # TODO(synk): for large Cin (>=256) add an 'arbitrary' K-reduction grid axis
    # with an f32 VMEM accumulator instead of keeping the full weight resident.
    return pl.pallas_call(
        _matmul_bias_kernel,
        out_shape=jax.ShapeDtypeStruct((n, cout), x2d.dtype),
        grid=(grid,),
        in_specs=[
            pl.BlockSpec((rt, cin), lambda i: (i, 0)),
            pl.BlockSpec((cin, cout), lambda i: (0, 0)),
            pl.BlockSpec((1, cout), lambda i: (0, 0)),
        ],
        out_specs=pl.BlockSpec((rt, cout), lambda i: (i, 0)),
        compiler_params=pltpu.CompilerParams(
            dimension_semantics=("parallel",),
            vmem_limit_bytes=_vmem_limit_bytes()),
        cost_estimate=cost,
    )(x2d, w, bias.reshape(1, cout))


# --------------------------------------------------------------------------
# Kernel 2: depthwise 3x3 conv (padding=1), NHWC, halo built in VMEM scratch.
#           Only the 1-pixel border of the scratch is zeroed; scratch keeps the
#           input dtype (halves the footprint for bf16 inputs).
# --------------------------------------------------------------------------
def _dwconv3x3_kernel(x_ref, w_ref, b_ref, o_ref, xp_ref):
    h, w, ct = o_ref.shape[1], o_ref.shape[2], o_ref.shape[3]
    xp_ref[0:1, :, :] = jnp.zeros((1, w + 2, ct), xp_ref.dtype)
    xp_ref[h + 1:h + 2, :, :] = jnp.zeros((1, w + 2, ct), xp_ref.dtype)
    xp_ref[1:h + 1, 0:1, :] = jnp.zeros((h, 1, ct), xp_ref.dtype)
    xp_ref[1:h + 1, w + 1:w + 2, :] = jnp.zeros((h, 1, ct), xp_ref.dtype)
    xp_ref[1:h + 1, 1:w + 1, :] = x_ref[0]
    wk = w_ref[...].astype(jnp.float32)                       # (3, 3, ct)
    acc = jnp.zeros((h, w, ct), jnp.float32)
    for dy in range(3):
        for dx in range(3):
            acc = acc + (xp_ref[dy:dy + h, dx:dx + w, :].astype(jnp.float32)
                         * wk[dy:dy + 1, dx:dx + 1, :])
    o_ref[0] = (acc + b_ref[...].astype(jnp.float32)).astype(o_ref.dtype)


def dwconv3x3(x_nhwc, w, bias):
    """x_nhwc: (B, H, W, C), w: (3, 3, C), bias: (C,) -> (B, H, W, C)."""
    b, h, ww, c = x_nhwc.shape
    ct = 128 if (c % 128 == 0) else c           # lane-sized channel tile when possible
    nct = c // ct
    itemsize = x_nhwc.dtype.itemsize
    cost = pl.CostEstimate(
        flops=2 * 9 * b * h * ww * c, transcendentals=0,
        bytes_accessed=itemsize * 2 * b * h * ww * c + 4 * 10 * c)
    # TODO(synk): for large H*W, add H-row tiling with a 1-row halo via manual DMA
    # (memory_space=pl.ANY) so per-step VMEM is resolution-independent (required on
    # v7x's 64 MiB VMEM at >=256x256), and fuse the qkv 1x1 conv into the same
    # row-tiled kernel to remove the (B,HW,3C) HBM round trip entirely.
    return pl.pallas_call(
        _dwconv3x3_kernel,
        out_shape=jax.ShapeDtypeStruct((b, h, ww, c), x_nhwc.dtype),
        grid=(b, nct),
        in_specs=[
            pl.BlockSpec((1, h, ww, ct), lambda i, j: (i, 0, 0, j)),
            pl.BlockSpec((3, 3, ct), lambda i, j: (0, 0, j)),
            pl.BlockSpec((1, ct), lambda i, j: (0, j)),
        ],
        out_specs=pl.BlockSpec((1, h, ww, ct), lambda i, j: (i, 0, 0, j)),
        scratch_shapes=[pltpu.VMEM((h + 2, ww + 2, ct), x_nhwc.dtype)],
        compiler_params=pltpu.CompilerParams(
            dimension_semantics=("parallel", "parallel"),
            vmem_limit_bytes=_vmem_limit_bytes()),
        cost_estimate=cost,
    )(x_nhwc, w, bias.reshape(1, c))


# --------------------------------------------------------------------------
# Kernel 3a: channel-attention stage 1 -- hw-streamed Gram / sum-of-squares
#            accumulation + L2-norm scaling + softmax. Output: tiny per-head
#            (ch x ch) attention matrices.
# --------------------------------------------------------------------------
def _attn_stage1_kernel(temp_ref, qkv_ref, attn_ref, gram_sc, sqq_sc, sqk_sc,
                        *, num_heads, dim, hw_total, hw_tile):
    j = pl.program_id(1)
    ch = dim // num_heads

    @pl.when(j == 0)
    def _():
        gram_sc[...] = jnp.zeros_like(gram_sc)
        sqq_sc[...] = jnp.zeros_like(sqq_sc)
        sqk_sc[...] = jnp.zeros_like(sqk_sc)

    x = qkv_ref[0].astype(jnp.float32)                        # (t, >= 2*dim)
    if hw_total % hw_tile != 0:                               # static: mask pad rows
        rows = hw_tile * j + lax.broadcasted_iota(jnp.int32, (hw_tile, 1), 0)
        x = jnp.where(rows < hw_total, x, 0.0)
    ones_col = jnp.ones((x.shape[0], 1), jnp.float32)

    for hd in range(num_heads):                               # static, unrolled
        q = x[:, hd * ch:(hd + 1) * ch]                       # (t, ch)
        k = x[:, dim + hd * ch:dim + (hd + 1) * ch]
        # Gram on RAW q,k (no qn/kn materialization); normalization applied to
        # the (ch x ch) Gram matrix later -> O(ch^2) instead of O(hw*ch) VPU work.
        gram_sc[hd] += lax.dot_general(_mxu(q), _mxu(k), (((0,), (0,)), ((), ())),
                                       preferred_element_type=jnp.float32)
        # per-channel sum of squares: column via MXU dot-with-ones, row via VPU/XLU
        sqq_sc[hd] += lax.dot_general(q * q, ones_col, (((0,), (0,)), ((), ())),
                                      preferred_element_type=jnp.float32)
        sqk_sc[hd] += jnp.sum(k * k, axis=0, keepdims=True)

    @pl.when(j == pl.num_programs(1) - 1)
    def _():
        for hd in range(num_heads):
            rq = lax.rsqrt(jnp.maximum(sqq_sc[hd], 1e-24))    # (ch, 1)
            rk = lax.rsqrt(jnp.maximum(sqk_sc[hd], 1e-24))    # (1, ch)
            a = gram_sc[hd] * rq * rk * temp_ref[hd]
            a = a - jnp.max(a, axis=-1, keepdims=True)
            a = jnp.exp(a)
            a = a * pl.reciprocal(jnp.sum(a, axis=-1, keepdims=True), approx=True)
            attn_ref[0, hd] = a


# --------------------------------------------------------------------------
# Kernel 3b: channel-attention stage 2 -- out = attn @ v per head, fused with
#            project_out (1x1 conv) + bias, hw-tiled and fully parallel.
# --------------------------------------------------------------------------
def _attn_stage2_kernel(attn_ref, qkv_ref, wp_ref, bp_ref, o_ref,
                        *, num_heads, dim, v_base):
    ch = dim // num_heads
    x = qkv_ref[0]                                            # (t, v_cols)
    wp = wp_ref[...].astype(jnp.float32)                      # (dim, dim)
    acc = jnp.zeros((x.shape[0], dim), jnp.float32)
    for hd in range(num_heads):                               # static, unrolled
        v = x[:, v_base + hd * ch:v_base + (hd + 1) * ch]     # (t, ch)
        a = attn_ref[0, hd]                                   # (ch, ch) f32
        # out_h[t, cq] = sum_ck v[t, ck] * attn[cq, ck]
        oh = lax.dot_general(_mxu(v), _mxu(a), (((1,), (1,)), ((), ())),
                             preferred_element_type=jnp.float32)
        # fused project_out: accumulate out_h @ W_proj[rows of this head]
        acc = acc + jnp.dot(_mxu(oh), _mxu(wp[hd * ch:(hd + 1) * ch, :]),
                            preferred_element_type=jnp.float32)
    o_ref[0] = (acc + bp_ref[...].astype(jnp.float32)).astype(o_ref.dtype)


def channel_attention(qkv_flat, temperature, w_proj, b_proj, *, num_heads, dim,
                      hw_tile=1024):
    """qkv_flat: (B, HW, 3*dim) -> projected output (B, HW, dim)."""
    b, hw, c3 = qkv_flat.shape
    ch = dim // num_heads
    t = hw if hw <= hw_tile else hw_tile
    n_t = pl.cdiv(hw, t)

    # Only DMA the q,k columns when they are lane-aligned; else read all 3*dim.
    qk_cols = 2 * dim if (2 * dim) % 128 == 0 else c3
    vmem = _vmem_limit_bytes()

    stage1 = functools.partial(_attn_stage1_kernel, num_heads=num_heads, dim=dim,
                               hw_total=hw, hw_tile=t)
    cost1 = pl.CostEstimate(
        flops=2 * b * num_heads * hw * ch * (ch + 1) + 4 * b * hw * dim,
        transcendentals=b * num_heads * ch * ch,
        bytes_accessed=4 * (b * hw * qk_cols + b * num_heads * ch * ch))
    attn = pl.pallas_call(
        stage1,
        out_shape=jax.ShapeDtypeStruct((b, num_heads, ch, ch), jnp.float32),
        grid=(b, n_t),
        in_specs=[
            pl.BlockSpec(memory_space=pltpu.MemorySpace.SMEM),          # temperature
            pl.BlockSpec((1, t, qk_cols), lambda i, j: (i, j, 0)),
        ],
        out_specs=pl.BlockSpec((1, num_heads, ch, ch), lambda i, j: (i, 0, 0, 0)),
        scratch_shapes=[
            pltpu.VMEM((num_heads, ch, ch), jnp.float32),
            pltpu.VMEM((num_heads, ch, 1), jnp.float32),
            pltpu.VMEM((num_heads, 1, ch), jnp.float32),
        ],
        compiler_params=pltpu.CompilerParams(
            dimension_semantics=("parallel", "arbitrary"),
            vmem_limit_bytes=vmem),
        cost_estimate=cost1,
    )(temperature, qkv_flat)

    # Only DMA the v columns when dim is lane-aligned; else read all 3*dim.
    if dim % 128 == 0:
        v_cols, v_block_idx, v_base = dim, 2, 0
    else:
        v_cols, v_block_idx, v_base = c3, 0, 2 * dim

    stage2 = functools.partial(_attn_stage2_kernel, num_heads=num_heads, dim=dim,
                               v_base=v_base)
    cost2 = pl.CostEstimate(
        flops=2 * b * hw * dim * (ch + dim), transcendentals=0,
        bytes_accessed=4 * (b * hw * v_cols + b * hw * dim + dim * dim))
    out = pl.pallas_call(
        stage2,
        out_shape=jax.ShapeDtypeStruct((b, hw, dim), qkv_flat.dtype),
        grid=(b, n_t),
        in_specs=[
            pl.BlockSpec((1, num_heads, ch, ch), lambda i, j: (i, 0, 0, 0)),
            pl.BlockSpec((1, t, v_cols), lambda i, j: (i, j, v_block_idx)),
            pl.BlockSpec((dim, dim), lambda i, j: (0, 0)),
            pl.BlockSpec((1, dim), lambda i, j: (0, 0)),
        ],
        out_specs=pl.BlockSpec((1, t, dim), lambda i, j: (i, j, 0)),
        compiler_params=pltpu.CompilerParams(
            dimension_semantics=("parallel", "parallel"),
            vmem_limit_bytes=vmem),
        cost_estimate=cost2,
    )(attn, qkv_flat, w_proj, b_proj.reshape(1, dim))
    return out


# --------------------------------------------------------------------------
# Full module forward (Pallas path)
# --------------------------------------------------------------------------
def trans_attention_forward(x_nchw, params, num_heads, *, hw_tile=1024):
    b, c, h, w = x_nchw.shape
    hw = h * w

    x = jnp.transpose(x_nchw, (0, 2, 3, 1))                   # NCHW -> NHWC (once)

    # qkv 1x1 conv
    qkv = conv1x1(x.reshape(b * hw, c), params["w_qkv"], params["b_qkv"])

    # depthwise 3x3 conv (NHWC, halo handled in-kernel)
    qkv = dwconv3x3(qkv.reshape(b, h, w, 3 * c), params["w_dw"], params["b_dw"])

    # hw-streamed channel attention with fused project_out
    out = channel_attention(qkv.reshape(b, hw, 3 * c), params["temperature"],
                            params["w_proj"], params["b_proj"],
                            num_heads=num_heads, dim=c, hw_tile=hw_tile)

    # TODO(synk): optionally pad dim / 3*dim to multiples of 128 at the pipeline
    # boundary (with masked softmax/norms) so all per-head slices are lane-aligned.
    return jnp.transpose(out.reshape(b, h, w, c), (0, 3, 1, 2))  # back to NCHW


# --------------------------------------------------------------------------
# Pure-JAX reference (mirrors the PyTorch forward exactly)
# --------------------------------------------------------------------------
def ref_forward(x_nchw, params, num_heads):
    b, c, h, w = x_nchw.shape
    ch = c // num_heads
    hw = h * w

    x = jnp.transpose(x_nchw, (0, 2, 3, 1))
    qkv = x.reshape(b * hw, c) @ params["w_qkv"] + params["b_qkv"]
    qkv = qkv.reshape(b, h, w, 3 * c)

    xp = jnp.pad(qkv, ((0, 0), (1, 1), (1, 1), (0, 0)))
    acc = jnp.zeros_like(qkv)
    for dy in range(3):
        for dx in range(3):
            acc = acc + xp[:, dy:dy + h, dx:dx + w, :] * params["w_dw"][dy, dx]
    qkv = acc + params["b_dw"]

    t = qkv.reshape(b, hw, 3, num_heads, ch).transpose(2, 0, 3, 4, 1)
    q, k, v = t[0], t[1], t[2]
    qn = q / jnp.maximum(jnp.linalg.norm(q, axis=-1, keepdims=True), 1e-12)
    kn = k / jnp.maximum(jnp.linalg.norm(k, axis=-1, keepdims=True), 1e-12)
    attn = jnp.einsum("bhcn,bhdn->bhcd", qn, kn)
    attn = attn * params["temperature"][None, :, None, None]
    attn = jax.nn.softmax(attn, axis=-1)
    out = jnp.einsum("bhcd,bhdn->bhcn", attn, v)

    out = out.transpose(0, 3, 1, 2).reshape(b, h, w, c)
    out = out.reshape(b * hw, c) @ params["w_proj"] + params["b_proj"]
    out = out.reshape(b, h, w, c)
    return jnp.transpose(out, (0, 3, 1, 2))


# --------------------------------------------------------------------------
# Deterministic parameter init (bias=True); shapes follow the module __init__
# --------------------------------------------------------------------------
def init_params(key, dim, num_heads):
    ks = jax.random.split(key, 6)
    s = 0.1
    return {
        "w_qkv": jax.random.normal(ks[0], (dim, 3 * dim), jnp.float32) * s,
        "b_qkv": jax.random.normal(ks[1], (3 * dim,), jnp.float32) * s,
        "w_dw": jax.random.normal(ks[2], (3, 3, 3 * dim), jnp.float32) * s,
        "b_dw": jax.random.normal(ks[3], (3 * dim,), jnp.float32) * s,
        "w_proj": jax.random.normal(ks[4], (dim, dim), jnp.float32) * s,
        "b_proj": jax.random.normal(ks[5], (dim,), jnp.float32) * s,
        # nn.Parameter(torch.ones(num_heads, 1, 1)) -> stored flat (num_heads,)
        "temperature": jnp.ones((num_heads,), jnp.float32),
    }


if __name__ == "__main__":
    dim, num_heads = 16, 4
    batch, H, W = 2, 16, 16

    key = jax.random.PRNGKey(0)
    kx, kp = jax.random.split(key)
    x = jax.random.normal(kx, (batch, dim, H, W), jnp.float32)
    params = init_params(kp, dim, num_heads)

    # hw_tile=128 -> HW=256 is streamed over 2 tiles per batch, exercising the
    # resolution-independent (Gram-accumulate + second-pass attn@V) attention path.
    out = trans_attention_forward(x, params, num_heads, hw_tile=128)
    out = jax.block_until_ready(out)

    ref = ref_forward(x, params, num_heads)
    assert out.shape == (batch, dim, H, W)
    max_err = float(jnp.max(jnp.abs(out - ref)))
    if max_err < 1e-2:
        print("KERNEL_OK")
    else:
        print(f"MISMATCH max_err={max_err}")
</pallas_src>

<mosaic_0001>
module attributes {stable_mosaic.version = 11 : i64} {
  func.func @_matmul_bias_kernel(%arg0: i32, %arg1: memref<512x16xf32, #tpu.memory_space<vmem>>, %arg2: memref<16x48xf32, #tpu.memory_space<vmem>>, %arg3: memref<1x48xf32, #tpu.memory_space<vmem>>, %arg4: memref<512x48xf32, #tpu.memory_space<vmem>>) attributes {dimension_semantics = [#tpu.dimension_semantics<parallel>], iteration_bounds = array<i64: 1>, scalar_prefetch = 0 : i64, scratch_operands = 0 : i64, tpu.core_type = #tpu.core_type<tc>, window_params = [{transform_indices = @transform_0, window_bounds = array<i64: 512, 16>}, {pipeline_mode = #tpu.pipeline_mode<synchronous>, transform_indices = @transform_1, window_bounds = array<i64: 16, 48>}, {pipeline_mode = #tpu.pipeline_mode<synchronous>, transform_indices = @transform_2, window_bounds = array<i64: 1, 48>}, {transform_indices = @transform_3, window_bounds = array<i64: 512, 48>}]} {
    %c0 = arith.constant 0 : index
    %c0_0 = arith.constant 0 : index
    %0 = vector.load %arg1[%c0, %c0_0] : memref<512x16xf32, #tpu.memory_space<vmem>>, vector<512x16xf32>
    %1 = arith.truncf %0 : vector<512x16xf32> to vector<512x16xbf16>
    %c0_1 = arith.constant 0 : index
    %c0_2 = arith.constant 0 : index
    %2 = vector.load %arg2[%c0_1, %c0_2] : memref<16x48xf32, #tpu.memory_space<vmem>>, vector<16x48xf32>
    %3 = arith.truncf %2 : vector<16x48xf32> to vector<16x48xbf16>
    %cst = arith.constant dense<0.000000e+00> : vector<512x48xf32>
    %4 = tpu.matmul %1, %3, %cst {dimension_numbers = #tpu.dot_dimension_numbers<[1], [0], [0], [1], [0, 0, 1, 1], [], []>} : vector<512x16xbf16>, vector<16x48xbf16>, vector<512x48xf32> -> vector<512x48xf32>
    %c0_3 = arith.constant 0 : index
    %c0_4 = arith.constant 0 : index
    %5 = vector.load %arg3[%c0_3, %c0_4] : memref<1x48xf32, #tpu.memory_space<vmem>>, vector<1x48xf32>
    %6 = vector.broadcast %5 : vector<1x48xf32> to vector<512x48xf32>
    %7 = arith.addf %4, %6 : vector<512x48xf32>
    %c0_5 = arith.constant 0 : index
    %c0_6 = arith.constant 0 : index
    %8 = vector.load %arg4[%c0_5, %c0_6] : memref<512x48xf32, #tpu.memory_space<vmem>>, vector<512x48xf32>
    tpu.vector_store %arg4[%c0_5, %c0_6], %7 {strides = array<i32>} : memref<512x48xf32, #tpu.memory_space<vmem>>, vector<512x48xf32>,
    return
  }
  func.func @transform_0(%arg0: i32) -> (i32, i32) {
    %c0_i32 = arith.constant 0 : i32
    %c0_i32_0 = arith.constant 0 : i32
    return %arg0, %c0_i32 : i32, i32
  }
  func.func @transform_1(%arg0: i32) -> (i32, i32) {
    %c0_i32 = arith.constant 0 : i32
    %c0_i32_0 = arith.constant 0 : i32
    %c0_i32_1 = arith.constant 0 : i32
    return %c0_i32, %c0_i32_0 : i32, i32
  }
  func.func @transform_2(%arg0: i32) -> (i32, i32) {
    %c0_i32 = arith.constant 0 : i32
    %c0_i32_0 = arith.constant 0 : i32
    %c0_i32_1 = arith.constant 0 : i32
    return %c0_i32, %c0_i32_0 : i32, i32
  }
  func.func @transform_3(%arg0: i32) -> (i32, i32) {
    %c0_i32 = arith.constant 0 : i32
    %c0_i32_0 = arith.constant 0 : i32
    return %arg0, %c0_i32 : i32, i32
  }
}

</mosaic_0001>

<bundles_post_ra>
// kernel: tpu_custom_call.1
= control target key start
LH: loop header
LB: loop body
LE: loop exit
PB: predicated region body
PF: predicated region fallthrough
CT: control target
= control target key end

     0   :  { %vm121_vm0 = vcmask 130048   ;;  %vm507_vm1 = vcmask 392192   ;;  %s1285_s1 = inlined_call_operand.vmem [shape: f32[16,48], index: 1, kind: input, shape index: {}]   ;;  %s1286_s0 = inlined_call_operand.vmem [shape: f32[512,16], index: 0, kind: input, shape index: {}]   ;;  %s1287_s2 = inlined_call_operand.vmem [shape: f32[1,48], index: 2, kind: input, shape index: {}]   ;;  %s1288_s3 = inlined_call_operand.vmem [shape: f32[512,48], index: 3, kind: output, shape index: {}]  }
   0x1   :  { %v111_v0 = vld [vmem:[%s1285_s1] sm:$0xff]  ;;  %v112_v1 = vld [vmem:[%s1285_s1 + $0x8] sm:$0xff]  ;;  %v17_v9 = vld [vmem:[%s1286_s0 + $0x10] sm:$0xff] }
   0x2   :  { %v15_v2 = vld [vmem:[%s1286_s0] sm:$0xff]  ;;  %v113_v3 = vpack.c.bf16 %v112_v1, %v111_v0  ;;  %v16_v4 = vld [vmem:[%s1286_s0 + $0x8] sm:$0xff]  ;;  %v18_v10 = vld [vmem:[%s1286_s0 + $0x18] sm:$0xff] }
   0x3   :  { %v47_v5 = vld [vmem:[%s1286_s0 + $0x100] sm:$0xff]  ;;  %v48_v6 = vld [vmem:[%s1286_s0 + $0x108] sm:$0xff]  ;;  %v79_v7 = vpack.c.bf16 %v16_v4, %v15_v2  ;;  %v49_v11 = vld [vmem:[%s1286_s0 + $0x110] sm:$0xff]  ;;  %v80_v12 = vpack.c.bf16 %v18_v10, %v17_v9 }
   0x4   :  { %v95_v8 = vpack.c.bf16 %v48_v6, %v47_v5  ;;  %642 = vmatprep.subr.bf16.mxu0 %v113_v3  ;;  %708 = vmatprep.subr.bf16.mxu1 %v113_v3  ;;  %v50_v13 = vld [vmem:[%s1286_s0 + $0x118] sm:$0xff]  ;;  %v19_v14 = vld [vmem:[%s1286_s0 + $0x20] sm:$0xff]  ;;  %v20_v15 = vld [vmem:[%s1286_s0 + $0x28] sm:$0xff] }
   0x5   :  { %643 = vmatpush3.bf16.msra.mxu0 %v113_v3  ;;  %709 = vmatpush3.bf16.msra.mxu1 %v113_v3  ;;  %v96_v16 = vpack.c.bf16 %v50_v13, %v49_v11  ;;  %v81_v17 = vpack.c.bf16 %v20_v15, %v19_v14  ;;  %v51_v18 = vld [vmem:[%s1286_s0 + $0x120] sm:$0xff]  ;;  %v52_v19 = vld [vmem:[%s1286_s0 + $0x128] sm:$0xff]  ;;  %v21_v21 = vld [vmem:[%s1286_s0 + $0x30] sm:$0xff] }
   0x6   :  { %644 = vmatprep.mubr.msk.bf16.mxu0 %vm121_vm0, %v79_v7  ;;  %676 = vmatprep.mubr.msk.bf16.mxu1 %vm121_vm0, %v95_v8  ;;  %v97_v20 = vpack.c.bf16 %v52_v19, %v51_v18  ;;  %v22_v22 = vld [vmem:[%s1286_s0 + $0x38] sm:$0xff]  ;;  %v53_v23 = vld [vmem:[%s1286_s0 + $0x130] sm:$0xff]  ;;  %v23_v25 = vld [vmem:[%s1286_s0 + $0x40] sm:$0xff] }
   0x7   :  { %v54_v24 = vld [vmem:[%s1286_s0 + $0x138] sm:$0xff]  ;;  %v24_v26 = vld [vmem:[%s1286_s0 + $0x48] sm:$0xff]  ;;  %v55_v27 = vld [vmem:[%s1286_s0 + $0x140] sm:$0xff]  ;;  %v82_v29 = vpack.c.bf16 %v22_v22, %v21_v21 }
   0x8   :  { %645 = vmatmul.mubr.msk.bf16.vlgmr.msra.gmra.mrb[0].mxu0 %vm121_vm0, %v80_v12  ;;  %677 = vmatmul.mubr.msk.bf16.vlgmr.msra.gmra.mrb[0].mxu1 %vm121_vm0, %v96_v16  ;;  %v56_v28 = vld [vmem:[%s1286_s0 + $0x148] sm:$0xff]  ;;  %v98_v30 = vpack.c.bf16 %v54_v24, %v53_v23  ;;  %v83_v31 = vpack.c.bf16 %v24_v26, %v23_v25  ;;  %v25_v33 = vld [vmem:[%s1286_s0 + $0x50] sm:$0xff]  ;;  %v26_v34 = vld [vmem:[%s1286_s0 + $0x58] sm:$0xff] }
   0x9   :  { %648 = vmatprep.mubr.msk.bf16.mxu0 %vm121_vm0, %v81_v17  ;;  %680 = vmatprep.mubr.msk.bf16.mxu1 %vm121_vm0, %v97_v20  ;;  %v99_v32 = vpack.c.bf16 %v56_v28, %v55_v27  ;;  %v57_v35 = vld [vmem:[%s1286_s0 + $0x150] sm:$0xff]  ;;  %v58_v36 = vld [vmem:[%s1286_s0 + $0x158] sm:$0xff]  ;;  %v27_v37 = vld [vmem:[%s1286_s0 + $0x60] sm:$0xff]  ;;  %v84_v41 = vpack.c.bf16 %v26_v34, %v25_v33 }
   0xa   :  { %v28_v38 = vld [vmem:[%s1286_s0 + $0x68] sm:$0xff]  ;;  %v59_v39 = vld [vmem:[%s1286_s0 + $0x160] sm:$0xff]  ;;  %v100_v42 = vpack.c.bf16 %v58_v36, %v57_v35  ;;  %v29_v45 = vld [vmem:[%s1286_s0 + $0x70] sm:$0xff] }
   0xb   :  { %v60_v40 = vld [vmem:[%s1286_s0 + $0x168] sm:$0xff]  ;;  %v85_v43 = vpack.c.bf16 %v28_v38, %v27_v37  ;;  %v30_v46 = vld [vmem:[%s1286_s0 + $0x78] sm:$0xff]  ;;  %v61_v47 = vld [vmem:[%s1286_s0 + $0x170] sm:$0xff] }
   0xc   :  { %v101_v44 = vpack.c.bf16 %v60_v40, %v59_v39  ;;  %v62_v48 = vld [vmem:[%s1286_s0 + $0x178] sm:$0xff]  ;;  %v31_v49 = vld [vmem:[%s1286_s0 + $0x80] sm:$0xff]  ;;  %v32_v50 = vld [vmem:[%s1286_s0 + $0x88] sm:$0xff]  ;;  %v86_v53 = vpack.c.bf16 %v30_v46, %v29_v45 }
   0xd   :  { %v63_v51 = vld [vmem:[%s1286_s0 + $0x180] sm:$0xff]  ;;  %v64_v52 = vld [vmem:[%s1286_s0 + $0x188] sm:$0xff]  ;;  %v102_v54 = vpack.c.bf16 %v62_v48, %v61_v47  ;;  %v87_v55 = vpack.c.bf16 %v32_v50, %v31_v49  ;;  %v33_v57 = vld [vmem:[%s1286_s0 + $0x90] sm:$0xff] }
   0xe   :  { %v103_v56 = vpack.c.bf16 %v64_v52, %v63_v51  ;;  %v34_v58 = vld [vmem:[%s1286_s0 + $0x98] sm:$0xff]  ;;  %v65_v59 = vld [vmem:[%s1286_s0 + $0x190] sm:$0xff]  ;;  %v35_v61 = vld [vmem:[%s1286_s0 + $0xa0] sm:$0xff] }
   0xf   :  { %v66_v60 = vld [vmem:[%s1286_s0 + $0x198] sm:$0xff]  ;;  %v36_v62 = vld [vmem:[%s1286_s0 + $0xa8] sm:$0xff]  ;;  %v67_v63 = vld [vmem:[%s1286_s0 + $0x1a0] sm:$0xff]  ;;  %v88_v1 = vpack.c.bf16 %v34_v58, %v33_v57 }
  0x10   :  { %649 = vmatmul.mubr.msk.bf16.gmra.mrb[4].mxu0 %vm121_vm0, %v82_v29  ;;  %681 = vmatmul.mubr.msk.bf16.gmra.mrb[4].mxu1 %vm121_vm0, %v98_v30  ;;  %v68_v0 = vld [vmem:[%s1286_s0 + $0x1a8] sm:$0xff]  ;;  %v104_v2 = vpack.c.bf16 %v66_v60, %v65_v59  ;;  %v89_v3 = vpack.c.bf16 %v36_v62, %v35_v61  ;;  %v37_v5 = vld [vmem:[%s1286_s0 + $0xb0] sm:$0xff]  ;;  %v38_v6 = vld [vmem:[%s1286_s0 + $0xb8] sm:$0xff] }
  0x11   :  { %652 = vmatprep.mubr.msk.bf16.mxu0 %vm121_vm0, %v83_v31  ;;  %684 = vmatprep.mubr.msk.bf16.mxu1 %vm121_vm0, %v99_v32  ;;  %v105_v4 = vpack.c.bf16 %v68_v0, %v67_v63  ;;  %v69_v7 = vld [vmem:[%s1286_s0 + $0x1b0] sm:$0xff]  ;;  %v70_v8 = vld [vmem:[%s1286_s0 + $0x1b8] sm:$0xff]  ;;  %v39_v9 = vld [vmem:[%s1286_s0 + $0xc0] sm:$0xff]  ;;  %v90_v13 = vpack.c.bf16 %v38_v6, %v37_v5 }
  0x12   :  { %v40_v10 = vld [vmem:[%s1286_s0 + $0xc8] sm:$0xff]  ;;  %v71_v11 = vld [vmem:[%s1286_s0 + $0x1c0] sm:$0xff]  ;;  %v106_v14 = vpack.c.bf16 %v70_v8, %v69_v7  ;;  %v41_v17 = vld [vmem:[%s1286_s0 + $0xd0] sm:$0xff] }
  0x13   :  { %v72_v12 = vld [vmem:[%s1286_s0 + $0x1c8] sm:$0xff]  ;;  %v91_v15 = vpack.c.bf16 %v40_v10, %v39_v9  ;;  %v42_v18 = vld [vmem:[%s1286_s0 + $0xd8] sm:$0xff]  ;;  %v73_v19 = vld [vmem:[%s1286_s0 + $0x1d0] sm:$0xff] }
  0x14   :  { %v107_v16 = vpack.c.bf16 %v72_v12, %v71_v11  ;;  %v74_v20 = vld [vmem:[%s1286_s0 + $0x1d8] sm:$0xff]  ;;  %v43_v21 = vld [vmem:[%s1286_s0 + $0xe0] sm:$0xff]  ;;  %v44_v22 = vld [vmem:[%s1286_s0 + $0xe8] sm:$0xff]  ;;  %v92_v25 = vpack.c.bf16 %v42_v18, %v41_v17 }
  0x15   :  { %v75_v23 = vld [vmem:[%s1286_s0 + $0x1e0] sm:$0xff]  ;;  %v76_v24 = vld [vmem:[%s1286_s0 + $0x1e8] sm:$0xff]  ;;  %v108_v26 = vpack.c.bf16 %v74_v20, %v73_v19  ;;  %v93_v27 = vpack.c.bf16 %v44_v22, %v43_v21  ;;  %v45_v29 = vld [vmem:[%s1286_s0 + $0xf0] sm:$0xff] }
  0x16   :  { %v109_v28 = vpack.c.bf16 %v76_v24, %v75_v23  ;;  %v46_v30 = vld [vmem:[%s1286_s0 + $0xf8] sm:$0xff]  ;;  %v77_v31 = vld [vmem:[%s1286_s0 + $0x1f0] sm:$0xff]  ;;  %v963_v35 = vld [vmem:[%s1287_s2] ss:$0 sm:$0xff] }
  0x17   :  { %v78_v32 = vld [vmem:[%s1286_s0 + $0x1f8] sm:$0xff]  ;;  %v94_v33 = vpack.c.bf16 %v46_v30, %v45_v29 }
  0x18   :  { %653 = vmatmul.mubr.msk.bf16.gmra.mrb[8].mxu0 %vm121_vm0, %v84_v41  ;;  %685 = vmatmul.mubr.msk.bf16.gmra.mrb[8].mxu1 %vm121_vm0, %v100_v42  ;;  %v110_v34 = vpack.c.bf16 %v78_v32, %v77_v31 }
  0x19   :  { %656 = vmatprep.mubr.msk.bf16.mxu0 %vm121_vm0, %v85_v43  ;;  %688 = vmatprep.mubr.msk.bf16.mxu1 %vm121_vm0, %v101_v44 }
  0x20   :  { %657 = vmatmul.mubr.msk.bf16.gmra.mrb[12].mxu0 %vm121_vm0, %v86_v53  ;;  %689 = vmatmul.mubr.msk.bf16.gmra.mrb[12].mxu1 %vm121_vm0, %v102_v54 }
  0x21   :  { %660 = vmatprep.mubr.msk.bf16.mxu0 %vm121_vm0, %v87_v55  ;;  %692 = vmatprep.mubr.msk.bf16.mxu1 %vm121_vm0, %v103_v56 }
  0x28   :  { %661 = vmatmul.mubr.msk.bf16.gmra.mrb[16].mxu0 %vm121_vm0, %v88_v1  ;;  %693 = vmatmul.mubr.msk.bf16.gmra.mrb[16].mxu1 %vm121_vm0, %v104_v2 }
  0x29   :  { %664 = vmatprep.mubr.msk.bf16.mxu0 %vm121_vm0, %v89_v3  ;;  %696 = vmatprep.mubr.msk.bf16.mxu1 %vm121_vm0, %v105_v4 }
  0x30   :  { %665 = vmatmul.mubr.msk.bf16.gmra.mrb[20].mxu0 %vm121_vm0, %v90_v13  ;;  %697 = vmatmul.mubr.msk.bf16.gmra.mrb[20].mxu1 %vm121_vm0, %v106_v14 }
  0x31   :  { %668 = vmatprep.mubr.msk.bf16.mxu0 %vm121_vm0, %v91_v15  ;;  %700 = vmatprep.mubr.msk.bf16.mxu1 %vm121_vm0, %v107_v16 }
  0x38   :  { %669 = vmatmul.mubr.msk.bf16.gmra.mrb[24].mxu0 %vm121_vm0, %v92_v25  ;;  %701 = vmatmul.mubr.msk.bf16.gmra.mrb[24].mxu1 %vm121_vm0, %v108_v26 }
  0x39   :  { %672 = vmatprep.mubr.msk.bf16.mxu0 %vm121_vm0, %v93_v27  ;;  %704 = vmatprep.mubr.msk.bf16.mxu1 %vm121_vm0, %v109_v28 }
  0x40   :  { %673 = vmatmul.mubr.msk.bf16.gmra.mrb[28].mxu0 %vm121_vm0, %v94_v33  ;;  %705 = vmatmul.mubr.msk.bf16.gmra.mrb[28].mxu1 %vm121_vm0, %v110_v34 }
  0xdb   :  { %v646_v36 = vpop.f32.mrb[0].mxu0  ;;  %v678_v37 = vpop.f32.mrb[0].mxu1 }
  0xdc   :  { %v261_v38 = vadd.f32 %v646_v36, %v963_v35  ;;  %v389_v39 = vadd.f32 %v678_v37, %v963_v35  ;;  %v252_v40 = vpop.f32.mrb[1].mxu0  ;;  %v380_v41 = vpop.f32.mrb[1].mxu1 }
  0xdd   :  { %v253_v42 = vadd.f32 %v963_v35, %v252_v40  ;;  %v381_v43 = vadd.f32 %v963_v35, %v380_v41  ;;  %v647_v44 = vpop.f32.mrb[2].mxu0  ;;  %v679_v45 = vpop.f32.mrb[2].mxu1 }
  0xde   :  { %510 = vst.msk [vmem:[%s1288_s3 + $0x10] sm:$0xff] %vm507_vm1, %v261_v38  ;;  %542 = vst.msk [vmem:[%s1288_s3 + $0x110] sm:$0xff] %vm507_vm1, %v389_v39  ;;  %v264_v46 = vadd.f32 %v647_v44, %v963_v35  ;;  %v392_v47 = vadd.f32 %v679_v45, %v963_v35  ;;  %v255_v48 = vpop.f32.mrb[3].mxu0  ;;  %v383_v49 = vpop.f32.mrb[3].mxu1 }
  0xdf   :  { %508 = vst.msk [vmem:[%s1288_s3] sm:$0xff] %vm507_vm1, %v253_v42  ;;  %540 = vst.msk [vmem:[%s1288_s3 + $0x100] sm:$0xff] %vm507_vm1, %v381_v43  ;;  %v256_v50 = vadd.f32 %v963_v35, %v255_v48  ;;  %v384_v51 = vadd.f32 %v963_v35, %v383_v49 }
  0xe0   :  { %511 = vst.msk [vmem:[%s1288_s3 + $0x18] sm:$0xff] %vm507_vm1, %v264_v46  ;;  %543 = vst.msk [vmem:[%s1288_s3 + $0x118] sm:$0xff] %vm507_vm1, %v392_v47 }
  0xe1   :  { %509 = vst.msk [vmem:[%s1288_s3 + $0x8] sm:$0xff] %vm507_vm1, %v256_v50  ;;  %541 = vst.msk [vmem:[%s1288_s3 + $0x108] sm:$0xff] %vm507_vm1, %v384_v51 }
  0xe3   :  { %v650_v52 = vpop.f32.mrb[4].mxu0  ;;  %v682_v53 = vpop.f32.mrb[4].mxu1 }
  0xe4   :  { %v277_v54 = vadd.f32 %v650_v52, %v963_v35  ;;  %v405_v55 = vadd.f32 %v682_v53, %v963_v35  ;;  %v268_v56 = vpop.f32.mrb[5].mxu0  ;;  %v396_v57 = vpop.f32.mrb[5].mxu1 }
  0xe5   :  { %v269_v58 = vadd.f32 %v963_v35, %v268_v56  ;;  %v397_v59 = vadd.f32 %v963_v35, %v396_v57  ;;  %v651_v60 = vpop.f32.mrb[6].mxu0  ;;  %v683_v61 = vpop.f32.mrb[6].mxu1 }
  0xe6   :  { %514 = vst.msk [vmem:[%s1288_s3 + $0x30] sm:$0xff] %vm507_vm1, %v277_v54  ;;  %546 = vst.msk [vmem:[%s1288_s3 + $0x130] sm:$0xff] %vm507_vm1, %v405_v55  ;;  %v280_v62 = vadd.f32 %v651_v60, %v963_v35  ;;  %v408_v63 = vadd.f32 %v683_v61, %v963_v35  ;;  %v271_v0 = vpop.f32.mrb[7].mxu0  ;;  %v399_v1 = vpop.f32.mrb[7].mxu1 }
  0xe7   :  { %512 = vst.msk [vmem:[%s1288_s3 + $0x20] sm:$0xff] %vm507_vm1, %v269_v58  ;;  %544 = vst.msk [vmem:[%s1288_s3 + $0x120] sm:$0xff] %vm507_vm1, %v397_v59  ;;  %v272_v2 = vadd.f32 %v963_v35, %v271_v0  ;;  %v400_v3 = vadd.f32 %v963_v35, %v399_v1 }
  0xe8   :  { %515 = vst.msk [vmem:[%s1288_s3 + $0x38] sm:$0xff] %vm507_vm1, %v280_v62  ;;  %547 = vst.msk [vmem:[%s1288_s3 + $0x138] sm:$0xff] %vm507_vm1, %v408_v63 }
  0xe9   :  { %513 = vst.msk [vmem:[%s1288_s3 + $0x28] sm:$0xff] %vm507_vm1, %v272_v2  ;;  %545 = vst.msk [vmem:[%s1288_s3 + $0x128] sm:$0xff] %vm507_vm1, %v400_v3 }
  0xeb   :  { %v654_v4 = vpop.f32.mrb[8].mxu0  ;;  %v686_v5 = vpop.f32.mrb[8].mxu1 }
  0xec   :  { %v293_v6 = vadd.f32 %v654_v4, %v963_v35  ;;  %v421_v7 = vadd.f32 %v686_v5, %v963_v35  ;;  %v284_v8 = vpop.f32.mrb[9].mxu0  ;;  %v412_v9 = vpop.f32.mrb[9].mxu1 }
  0xed   :  { %v285_v10 = vadd.f32 %v963_v35, %v284_v8  ;;  %v413_v11 = vadd.f32 %v963_v35, %v412_v9  ;;  %v655_v12 = vpop.f32.mrb[10].mxu0  ;;  %v687_v13 = vpop.f32.mrb[10].mxu1 }
  0xee   :  { %518 = vst.msk [vmem:[%s1288_s3 + $0x50] sm:$0xff] %vm507_vm1, %v293_v6  ;;  %550 = vst.msk [vmem:[%s1288_s3 + $0x150] sm:$0xff] %vm507_vm1, %v421_v7  ;;  %v296_v14 = vadd.f32 %v655_v12, %v963_v35  ;;  %v424_v15 = vadd.f32 %v687_v13, %v963_v35  ;;  %v287_v16 = vpop.f32.mrb[11].mxu0  ;;  %v415_v17 = vpop.f32.mrb[11].mxu1 }
  0xef   :  { %516 = vst.msk [vmem:[%s1288_s3 + $0x40] sm:$0xff] %vm507_vm1, %v285_v10  ;;  %548 = vst.msk [vmem:[%s1288_s3 + $0x140] sm:$0xff] %vm507_vm1, %v413_v11  ;;  %v288_v18 = vadd.f32 %v963_v35, %v287_v16  ;;  %v416_v19 = vadd.f32 %v963_v35, %v415_v17 }
  0xf0   :  { %519 = vst.msk [vmem:[%s1288_s3 + $0x58] sm:$0xff] %vm507_vm1, %v296_v14  ;;  %551 = vst.msk [vmem:[%s1288_s3 + $0x158] sm:$0xff] %vm507_vm1, %v424_v15 }
  0xf1   :  { %517 = vst.msk [vmem:[%s1288_s3 + $0x48] sm:$0xff] %vm507_vm1, %v288_v18  ;;  %549 = vst.msk [vmem:[%s1288_s3 + $0x148] sm:$0xff] %vm507_vm1, %v416_v19 }
  0xf3   :  { %v658_v20 = vpop.f32.mrb[12].mxu0  ;;  %v690_v21 = vpop.f32.mrb[12].mxu1 }
  0xf4   :  { %v309_v22 = vadd.f32 %v658_v20, %v963_v35  ;;  %v437_v23 = vadd.f32 %v690_v21, %v963_v35  ;;  %v300_v24 = vpop.f32.mrb[13].mxu0  ;;  %v428_v25 = vpop.f32.mrb[13].mxu1 }
  0xf5   :  { %v301_v26 = vadd.f32 %v963_v35, %v300_v24  ;;  %v429_v27 = vadd.f32 %v963_v35, %v428_v25  ;;  %v659_v28 = vpop.f32.mrb[14].mxu0  ;;  %v691_v29 = vpop.f32.mrb[14].mxu1 }
  0xf6   :  { %522 = vst.msk [vmem:[%s1288_s3 + $0x70] sm:$0xff] %vm507_vm1, %v309_v22  ;;  %554 = vst.msk [vmem:[%s1288_s3 + $0x170] sm:$0xff] %vm507_vm1, %v437_v23  ;;  %v312_v30 = vadd.f32 %v659_v28, %v963_v35  ;;  %v440_v31 = vadd.f32 %v691_v29, %v963_v35  ;;  %v303_v32 = vpop.f32.mrb[15].mxu0  ;;  %v431_v33 = vpop.f32.mrb[15].mxu1 }
  0xf7   :  { %520 = vst.msk [vmem:[%s1288_s3 + $0x60] sm:$0xff] %vm507_vm1, %v301_v26  ;;  %552 = vst.msk [vmem:[%s1288_s3 + $0x160] sm:$0xff] %vm507_vm1, %v429_v27  ;;  %v304_v34 = vadd.f32 %v963_v35, %v303_v32  ;;  %v432_v36 = vadd.f32 %v963_v35, %v431_v33 }
  0xf8   :  { %523 = vst.msk [vmem:[%s1288_s3 + $0x78] sm:$0xff] %vm507_vm1, %v312_v30  ;;  %555 = vst.msk [vmem:[%s1288_s3 + $0x178] sm:$0xff] %vm507_vm1, %v440_v31 }
  0xf9   :  { %521 = vst.msk [vmem:[%s1288_s3 + $0x68] sm:$0xff] %vm507_vm1, %v304_v34  ;;  %553 = vst.msk [vmem:[%s1288_s3 + $0x168] sm:$0xff] %vm507_vm1, %v432_v36 }
  0xfb   :  { %v662_v37 = vpop.f32.mrb[16].mxu0  ;;  %v694_v38 = vpop.f32.mrb[16].mxu1 }
  0xfc   :  { %v325_v39 = vadd.f32 %v662_v37, %v963_v35  ;;  %v453_v40 = vadd.f32 %v694_v38, %v963_v35  ;;  %v316_v41 = vpop.f32.mrb[17].mxu0  ;;  %v444_v42 = vpop.f32.mrb[17].mxu1 }
  0xfd   :  { %v317_v43 = vadd.f32 %v963_v35, %v316_v41  ;;  %v445_v44 = vadd.f32 %v963_v35, %v444_v42  ;;  %v663_v45 = vpop.f32.mrb[18].mxu0  ;;  %v695_v46 = vpop.f32.mrb[18].mxu1 }
  0xfe   :  { %526 = vst.msk [vmem:[%s1288_s3 + $0x90] sm:$0xff] %vm507_vm1, %v325_v39  ;;  %558 = vst.msk [vmem:[%s1288_s3 + $0x190] sm:$0xff] %vm507_vm1, %v453_v40  ;;  %v328_v47 = vadd.f32 %v663_v45, %v963_v35  ;;  %v456_v48 = vadd.f32 %v695_v46, %v963_v35  ;;  %v319_v49 = vpop.f32.mrb[19].mxu0  ;;  %v447_v50 = vpop.f32.mrb[19].mxu1 }
  0xff   :  { %524 = vst.msk [vmem:[%s1288_s3 + $0x80] sm:$0xff] %vm507_vm1, %v317_v43  ;;  %556 = vst.msk [vmem:[%s1288_s3 + $0x180] sm:$0xff] %vm507_vm1, %v445_v44  ;;  %v320_v51 = vadd.f32 %v963_v35, %v319_v49  ;;  %v448_v52 = vadd.f32 %v963_v35, %v447_v50 }
 0x100   :  { %527 = vst.msk [vmem:[%s1288_s3 + $0x98] sm:$0xff] %vm507_vm1, %v328_v47  ;;  %559 = vst.msk [vmem:[%s1288_s3 + $0x198] sm:$0xff] %vm507_vm1, %v456_v48 }
 0x101   :  { %525 = vst.msk [vmem:[%s1288_s3 + $0x88] sm:$0xff] %vm507_vm1, %v320_v51  ;;  %557 = vst.msk [vmem:[%s1288_s3 + $0x188] sm:$0xff] %vm507_vm1, %v448_v52 }
 0x103   :  { %v666_v53 = vpop.f32.mrb[20].mxu0  ;;  %v698_v54 = vpop.f32.mrb[20].mxu1 }
 0x104   :  { %v341_v55 = vadd.f32 %v666_v53, %v963_v35  ;;  %v469_v56 = vadd.f32 %v698_v54, %v963_v35  ;;  %v332_v57 = vpop.f32.mrb[21].mxu0  ;;  %v460_v58 = vpop.f32.mrb[21].mxu1 }
 0x105   :  { %v333_v59 = vadd.f32 %v963_v35, %v332_v57  ;;  %v461_v60 = vadd.f32 %v963_v35, %v460_v58  ;;  %v667_v61 = vpop.f32.mrb[22].mxu0  ;;  %v699_v62 = vpop.f32.mrb[22].mxu1 }
 0x106   :  { %530 = vst.msk [vmem:[%s1288_s3 + $0xb0] sm:$0xff] %vm507_vm1, %v341_v55  ;;  %562 = vst.msk [vmem:[%s1288_s3 + $0x1b0] sm:$0xff] %vm507_vm1, %v469_v56  ;;  %v344_v63 = vadd.f32 %v667_v61, %v963_v35  ;;  %v472_v0 = vadd.f32 %v699_v62, %v963_v35  ;;  %v335_v1 = vpop.f32.mrb[23].mxu0  ;;  %v463_v2 = vpop.f32.mrb[23].mxu1 }
 0x107   :  { %528 = vst.msk [vmem:[%s1288_s3 + $0xa0] sm:$0xff] %vm507_vm1, %v333_v59  ;;  %560 = vst.msk [vmem:[%s1288_s3 + $0x1a0] sm:$0xff] %vm507_vm1, %v461_v60  ;;  %v336_v3 = vadd.f32 %v963_v35, %v335_v1  ;;  %v464_v4 = vadd.f32 %v963_v35, %v463_v2 }
 0x108   :  { %531 = vst.msk [vmem:[%s1288_s3 + $0xb8] sm:$0xff] %vm507_vm1, %v344_v63  ;;  %563 = vst.msk [vmem:[%s1288_s3 + $0x1b8] sm:$0xff] %vm507_vm1, %v472_v0 }
 0x109   :  { %529 = vst.msk [vmem:[%s1288_s3 + $0xa8] sm:$0xff] %vm507_vm1, %v336_v3  ;;  %561 = vst.msk [vmem:[%s1288_s3 + $0x1a8] sm:$0xff] %vm507_vm1, %v464_v4 }
 0x10b   :  { %v670_v5 = vpop.f32.mrb[24].mxu0  ;;  %v702_v6 = vpop.f32.mrb[24].mxu1 }
 0x10c   :  { %v357_v7 = vadd.f32 %v670_v5, %v963_v35  ;;  %v485_v8 = vadd.f32 %v702_v6, %v963_v35  ;;  %v348_v9 = vpop.f32.mrb[25].mxu0  ;;  %v476_v10 = vpop.f32.mrb[25].mxu1 }
 0x10d   :  { %v349_v11 = vadd.f32 %v963_v35, %v348_v9  ;;  %v477_v12 = vadd.f32 %v963_v35, %v476_v10  ;;  %v671_v13 = vpop.f32.mrb[26].mxu0  ;;  %v703_v14 = vpop.f32.mrb[26].mxu1 }
 0x10e   :  { %534 = vst.msk [vmem:[%s1288_s3 + $0xd0] sm:$0xff] %vm507_vm1, %v357_v7  ;;  %566 = vst.msk [vmem:[%s1288_s3 + $0x1d0] sm:$0xff] %vm507_vm1, %v485_v8  ;;  %v360_v15 = vadd.f32 %v671_v13, %v963_v35  ;;  %v488_v16 = vadd.f32 %v703_v14, %v963_v35  ;;  %v351_v17 = vpop.f32.mrb[27].mxu0  ;;  %v479_v18 = vpop.f32.mrb[27].mxu1 }
 0x10f   :  { %532 = vst.msk [vmem:[%s1288_s3 + $0xc0] sm:$0xff] %vm507_vm1, %v349_v11  ;;  %564 = vst.msk [vmem:[%s1288_s3 + $0x1c0] sm:$0xff] %vm507_vm1, %v477_v12  ;;  %v352_v19 = vadd.f32 %v963_v35, %v351_v17  ;;  %v480_v20 = vadd.f32 %v963_v35, %v479_v18 }
 0x110   :  { %535 = vst.msk [vmem:[%s1288_s3 + $0xd8] sm:$0xff] %vm507_vm1, %v360_v15  ;;  %567 = vst.msk [vmem:[%s1288_s3 + $0x1d8] sm:$0xff] %vm507_vm1, %v488_v16 }
 0x111   :  { %533 = vst.msk [vmem:[%s1288_s3 + $0xc8] sm:$0xff] %vm507_vm1, %v352_v19  ;;  %565 = vst.msk [vmem:[%s1288_s3 + $0x1c8] sm:$0xff] %vm507_vm1, %v480_v20 }
 0x113   :  { %v674_v21 = vpop.f32.mrb[28].mxu0  ;;  %v706_v22 = vpop.f32.mrb[28].mxu1 }
 0x114   :  { %v373_v23 = vadd.f32 %v674_v21, %v963_v35  ;;  %v501_v24 = vadd.f32 %v706_v22, %v963_v35  ;;  %v364_v25 = vpop.f32.mrb[29].mxu0  ;;  %v492_v26 = vpop.f32.mrb[29].mxu1 }
 0x115   :  { %v365_v27 = vadd.f32 %v963_v35, %v364_v25  ;;  %v493_v28 = vadd.f32 %v963_v35, %v492_v26  ;;  %v675_v29 = vpop.f32.mrb[30].mxu0  ;;  %v707_v30 = vpop.f32.mrb[30].mxu1 }
 0x116   :  { %538 = vst.msk [vmem:[%s1288_s3 + $0xf0] sm:$0xff] %vm507_vm1, %v373_v23  ;;  %570 = vst.msk [vmem:[%s1288_s3 + $0x1f0] sm:$0xff] %vm507_vm1, %v501_v24  ;;  %v376_v31 = vadd.f32 %v675_v29, %v963_v35  ;;  %v504_v32 = vadd.f32 %v707_v30, %v963_v35  ;;  %v367_v33 = vpop.f32.mrb[31].mxu0  ;;  %v495_v34 = vpop.f32.mrb[31].mxu1 }
 0x117   :  { %536 = vst.msk [vmem:[%s1288_s3 + $0xe0] sm:$0xff] %vm507_vm1, %v365_v27  ;;  %568 = vst.msk [vmem:[%s1288_s3 + $0x1e0] sm:$0xff] %vm507_vm1, %v493_v28  ;;  %v368_v36 = vadd.f32 %v963_v35, %v367_v33  ;;  %v496_v37 = vadd.f32 %v963_v35, %v495_v34 }
 0x118   :  { %539 = vst.msk [vmem:[%s1288_s3 + $0xf8] sm:$0xff] %vm507_vm1, %v376_v31  ;;  %571 = vst.msk [vmem:[%s1288_s3 + $0x1f8] sm:$0xff] %vm507_vm1, %v504_v32 }
 0x119   :  { %537 = vst.msk [vmem:[%s1288_s3 + $0xe8] sm:$0xff] %vm507_vm1, %v368_v36  ;;  %569 = vst.msk [vmem:[%s1288_s3 + $0x1e8] sm:$0xff] %vm507_vm1, %v496_v37 }

</bundles_post_ra>
